<compile_context>
chip_gen: v5e
topology: v5e:2x2
jax: 0.10.0
libtpu: 0.0.40
codegen_flags: <defaults>
</compile_context>

<pallas_src>
import functools
import math

import jax
import jax.numpy as jnp
from jax.experimental import pallas as pl
from jax.experimental.pallas import tpu as pltpu

_SIGMA = 5.5
_MAX_TILE_BYTES = 4 * 1024 * 1024   # streamed-input bytes per grid step (double-buffered)


def _gauss_loss_kernel(cx_ref, cy_ref, x_ref, out_ref, *,
                       tile_rows, lane, total_rows, w, k, half,
                       neg_inv_two_sigma2, pos_scale, neg_w, needs_mask):
    bi = pl.program_id(0)          # sample index
    ti = pl.program_id(1)          # row-tile index within the sample

    cx = cx_ref[bi]                # image-row of this sample's center
    cy = cy_ref[bi]                # image-col of this sample's center

    x = x_ref[0].astype(jnp.float32)                       # (tile_rows, lane)
    sr = jax.lax.broadcasted_iota(jnp.int32, (tile_rows, lane), 0)

    if needs_mask:
        # Ragged tail along the sub-row axis: sanitize undefined out-of-bounds
        # data (0 * NaN = NaN) and zero its contribution via sp below.
        valid = (ti * tile_rows + sr) < total_rows
        x = jnp.where(valid, x, 0.0)

    # Shared softplus-style piece of binary_cross_entropy_with_logits:
    #   bce(x, t) = max(x, 0) - x * t + log1p(exp(-|x|)) = sp - x * t
    sp = jnp.maximum(x, 0.0) + jnp.log1p(jnp.exp(-jnp.abs(x)))
    if needs_mask:
        sp = jnp.where(valid, sp, 0.0)

    # Image rows covered by this tile (each sub-row of `lane` spans k image rows).
    row_base = ti * (tile_rows * k)
    overlaps = jnp.logical_and(cx + half >= row_base,
                               cx - half <= row_base + tile_rows * k - 1)

    def pos_tile():
        # Only the tile(s) containing the R x R window run this path.
        cl = jax.lax.broadcasted_iota(jnp.int32, (tile_rows, lane), 1)
        if k == 1:                       # spatial layout: lane == w
            r = row_base + sr
            c = cl
        else:                            # lane-dense layout: w | 128, power of two
            shift = int(round(math.log2(w)))
            r = row_base + sr * k + (cl >> shift)
            c = cl & (w - 1)
        dr = r - cx
        dc = c - cy
        tgt = jnp.logical_and(jnp.abs(dr) <= half,
                              jnp.abs(dc) <= half).astype(jnp.float32)
        drf = dr.astype(jnp.float32)
        dcf = dc.astype(jnp.float32)
        gauss = jnp.exp((drf * drf + dcf * dcf) * neg_inv_two_sigma2) * pos_scale
        # gauss*pos_scale at positives, neg_w at negatives (tgt is exactly 0/1).
        wgt = tgt * (gauss - neg_w) + neg_w
        return jnp.sum(wgt * (sp - x * tgt))

    def neg_tile():
        # No positives here: weight is the constant neg_w everywhere, target 0.
        return neg_w * jnp.sum(sp)

    partial = jax.lax.cond(overlaps, pos_tile, neg_tile)
    out_ref[...] = jnp.zeros_like(out_ref) + partial


def _choose_tile_rows(total_rows, lane, in_bytes):
    sub = 16 if in_bytes < 4 else 8       # bf16 packs 2 rows per sublane
    max_rows = max(sub, _MAX_TILE_BYTES // (lane * in_bytes))
    if total_rows <= max_rows:
        return total_rows                 # one full-height block per sample
    base = (max_rows // sub) * sub
    for cand in range(base, sub - 1, -sub):   # prefer a divisor -> no ragged tail
        if total_rows % cand == 0:
            return cand
    return max(sub, base)


@functools.partial(jax.jit, static_argnames=("center_R", "neg_weight"))
def gaussian_loss(cls_input, center_rate, center_R=5, neg_weight=1.0):
    """Forward pass of GaussianLoss (`neg_weight` is unused, as in the original)."""
    b, c, h, w = cls_input.shape
    # TODO(synk): center_R == 2 (create_labels_2), even R, windows clipped by the
    # image border, and c > 1 all error inside the original PyTorch module and
    # are not replicated here.
    assert c == 1, "GaussianLoss weight assignment requires c == 1"
    assert center_R % 2 == 1 and center_R != 2

    ratex, ratey = center_rate
    cx = jnp.round(ratex * (h - 1)).astype(jnp.int32)    # (b,) row centers
    cy = jnp.round(ratey * (w - 1)).astype(jnp.int32)    # (b,) col centers

    half = center_R // 2
    inv_two_sigma2 = 1.0 / (2.0 * _SIGMA * _SIGMA)
    gsum = sum(math.exp(-(i * i + j * j) * inv_two_sigma2)
               for i in range(-half, half + 1)
               for j in range(-half, half + 1))
    pos_scale = 1.0 / (gsum * b)                         # gauss/gsum then /b
    neg_num = float(b * (h * w - center_R * center_R))   # unclipped windows
    neg_w = 80.0 / neg_num

    # Lane-dense flattening: if the map is narrower than a vreg and the flat
    # row-major length tiles cleanly into 128-lane sub-rows, view each sample
    # as (h*w/128, 128); otherwise keep the spatial (h, w) layout.
    L = h * w
    if w < 128 and 128 % w == 0 and L % 128 == 0:
        lane = 128
    else:
        lane = w
    k = lane // w                     # image rows per sub-row (>= 1)
    total_rows = L // lane
    x3 = cls_input.reshape(b, total_rows, lane)          # pure view; no pad/copy

    in_bytes = jnp.dtype(cls_input.dtype).itemsize
    tile_rows = _choose_tile_rows(total_rows, lane, in_bytes)
    n_tiles = -(-total_rows // tile_rows)
    needs_mask = (n_tiles * tile_rows != total_rows)

    kernel = functools.partial(
        _gauss_loss_kernel,
        tile_rows=tile_rows, lane=lane, total_rows=total_rows, w=w, k=k,
        half=half, neg_inv_two_sigma2=-inv_two_sigma2,
        pos_scale=pos_scale, neg_w=neg_w, needs_mask=needs_mask)

    partials = pl.pallas_call(
        kernel,
        out_shape=jax.ShapeDtypeStruct((b, n_tiles, 8, 128), jnp.float32),
        grid_spec=pltpu.PrefetchScalarGridSpec(
            num_scalar_prefetch=2,
            grid=(b, n_tiles),
            in_specs=[
                pl.BlockSpec((1, tile_rows, lane), lambda bi, ti, *_: (bi, ti, 0)),
            ],
            out_specs=pl.BlockSpec((1, 1, 8, 128),
                                   lambda bi, ti, *_: (bi, ti, 0, 0)),
        ),
        compiler_params=pltpu.CompilerParams(
            dimension_semantics=("parallel", "parallel"),
            vmem_limit_bytes=32 * 1024 * 1024),
    )(cx, cy, x3)

    # weight.sum() is analytically 1 (each sample's normalized gaussian / b,
    # summed over b samples) + 80 (neg_num * 80/neg_num) = 81 for unclipped
    # windows, so `weight /= weight.sum()` + reduction='sum' is a constant
    # divide outside the kernel.
    return jnp.sum(partials[:, :, 0, 0]) / 81.0


def _reference_loss(cls_input, center_rate, center_R, sigma=_SIGMA):
    """Pure-JAX replica of the PyTorch forward (c == 1, unclipped windows)."""
    b, c, h, w = cls_input.shape
    ratex, ratey = center_rate
    X = jnp.round(ratex * (h - 1)).astype(jnp.int32)
    Y = jnp.round(ratey * (w - 1)).astype(jnp.int32)
    half = center_R // 2
    coords = jnp.arange(center_R, dtype=jnp.float32) - half
    xx, yy = jnp.meshgrid(coords, coords)
    g = jnp.exp(-(xx ** 2 + yy ** 2) / (2.0 * sigma ** 2))
    g = g / jnp.sum(g)

    def one(cxi, cyi):
        z = jnp.zeros((h, w), jnp.float32)
        tgt = jax.lax.dynamic_update_slice(
            z, jnp.ones((center_R, center_R), jnp.float32),
            (cxi - half, cyi - half))
        wpos = jax.lax.dynamic_update_slice(z, g / b, (cxi - half, cyi - half))
        return tgt, wpos

    tgt, wpos = jax.vmap(one)(X, Y)
    tgt = tgt[:, None]
    wpos = wpos[:, None]
    neg = tgt == 0.0
    neg_num = jnp.sum(neg).astype(jnp.float32)
    weight = jnp.where(tgt == 1.0, wpos, 0.0)
    weight = jnp.where(neg, 80.0 / neg_num, weight)
    weight = weight / jnp.sum(weight)
    x = cls_input.astype(jnp.float32)
    elem = jnp.maximum(x, 0.0) - x * tgt + jnp.log1p(jnp.exp(-jnp.abs(x)))
    return jnp.sum(weight * elem)


if __name__ == "__main__":
    key = jax.random.PRNGKey(0)
    k1, k2, k3 = jax.random.split(key, 3)
    b, c, h, w = 2, 1, 16, 16
    center_R = 5

    cls_input = jax.random.normal(k1, (b, c, h, w), dtype=jnp.float32)
    # rates in [0.2, 0.8] keep the R x R window fully in bounds (the original
    # PyTorch module errors on clipped windows).
    ratex = jax.random.uniform(k2, (b,), minval=0.2, maxval=0.8)
    ratey = jax.random.uniform(k3, (b,), minval=0.2, maxval=0.8)
    center_rate = (ratex, ratey)

    loss = gaussian_loss(cls_input, center_rate, center_R=center_R)
    loss = jax.block_until_ready(loss)

    ref = _reference_loss(cls_input, center_rate, center_R)
    assert jnp.allclose(loss, ref, rtol=1e-5, atol=1e-5), (loss, ref)
    print("KERNEL_OK")
</pallas_src>

<mosaic_0001>
module attributes {stable_mosaic.version = 11 : i64} {
  func.func @_gauss_loss_kernel(%arg0: i32, %arg1: i32, %arg2: memref<2xi32, #tpu.memory_space<smem>>, %arg3: memref<2xi32, #tpu.memory_space<smem>>, %arg4: memref<1x2x128xf32, #tpu.memory_space<vmem>>, %arg5: memref<1x1x8x128xf32, #tpu.memory_space<vmem>>) attributes {dimension_semantics = [#tpu.dimension_semantics<parallel>, #tpu.dimension_semantics<parallel>], iteration_bounds = array<i64: 2, 1>, scalar_prefetch = 2 : i64, scratch_operands = 0 : i64, tpu.core_type = #tpu.core_type<tc>, window_params = [{transform_indices = @transform_0, window_bounds = array<i64: 1, 2, 128>}, {transform_indices = @transform_1, window_bounds = array<i64: 1, 1, 8, 128>}]} {
    %0 = arith.index_cast %arg0 : i32 to index
    %1 = memref.load %arg2[%0] : memref<2xi32, #tpu.memory_space<smem>>
    %2 = arith.index_cast %arg0 : i32 to index
    %3 = memref.load %arg3[%2] : memref<2xi32, #tpu.memory_space<smem>>
    %c0 = arith.constant 0 : index
    %c0_0 = arith.constant 0 : index
    %c0_1 = arith.constant 0 : index
    %4 = vector.load %arg4[%c0, %c0_0, %c0_1] : memref<1x2x128xf32, #tpu.memory_space<vmem>>, vector<1x2x128xf32>
    %5 = vector.shape_cast %4 : vector<1x2x128xf32> to vector<2x128xf32>
    %6 = tpu.iota {dimensions = array<i32: 0>} : vector<2x128xi32>
    %cst = arith.constant 0.000000e+00 : f32
    %7 = vector.broadcast %cst : f32 to vector<2x128xf32>
    %8 = arith.maximumf %5, %7 : vector<2x128xf32>
    %9 = math.absf %5 : vector<2x128xf32>
    %cst_2 = arith.constant 0.000000e+00 : f32
    %10 = vector.broadcast %cst_2 : f32 to vector<2x128xf32>
    %11 = arith.subf %10, %9 : vector<2x128xf32>
    %12 = math.exp %11 : vector<2x128xf32>
    %13 = math.log1p %12 : vector<2x128xf32>
    %14 = arith.addf %8, %13 : vector<2x128xf32>
    %c16_i32 = arith.constant 16 : i32
    %15 = arith.muli %arg1, %c16_i32 : i32
    %c2_i32 = arith.constant 2 : i32
    %16 = arith.addi %1, %c2_i32 : i32
    %17 = arith.cmpi sge, %16, %15 : i32
    %c2_i32_3 = arith.constant 2 : i32
    %18 = arith.subi %1, %c2_i32_3 : i32
    %c16_i32_4 = arith.constant 16 : i32
    %19 = arith.addi %15, %c16_i32_4 : i32
    %c1_i32 = arith.constant 1 : i32
    %20 = arith.subi %19, %c1_i32 : i32
    %21 = arith.cmpi sle, %18, %20 : i32
    %22 = arith.andi %17, %21 : i1
    %23 = arith.extui %22 : i1 to i32
    %c0_i32 = arith.constant 0 : i32
    %24 = arith.cmpi ne, %23, %c0_i32 : i32
    %25 = scf.if %24 -> (f32) {
      %30 = tpu.iota {dimensions = array<i32: 1>} : vector<2x128xi32>
      %c8_i32 = arith.constant 8 : i32
      %31 = vector.broadcast %c8_i32 : i32 to vector<2x128xi32>
      %32 = arith.muli %6, %31 : vector<2x128xi32>
      %33 = vector.broadcast %15 : i32 to vector<2x128xi32>
      %34 = arith.addi %33, %32 : vector<2x128xi32>
      %c4_i32 = arith.constant 4 : i32
      %35 = vector.broadcast %c4_i32 : i32 to vector<2x128xi32>
      %36 = arith.shrsi %30, %35 : vector<2x128xi32>
      %37 = arith.addi %34, %36 : vector<2x128xi32>
      %c15_i32 = arith.constant 15 : i32
      %38 = vector.broadcast %c15_i32 : i32 to vector<2x128xi32>
      %39 = arith.andi %30, %38 : vector<2x128xi32>
      %40 = vector.broadcast %1 : i32 to vector<2x128xi32>
      %41 = arith.subi %37, %40 : vector<2x128xi32>
      %42 = vector.broadcast %3 : i32 to vector<2x128xi32>
      %43 = arith.subi %39, %42 : vector<2x128xi32>
      %44 = math.absi %41 : vector<2x128xi32>
      %c2_i32_10 = arith.constant 2 : i32
      %45 = vector.broadcast %c2_i32_10 : i32 to vector<2x128xi32>
      %46 = arith.cmpi sle, %44, %45 : vector<2x128xi32>
      %47 = math.absi %43 : vector<2x128xi32>
      %c2_i32_11 = arith.constant 2 : i32
      %48 = vector.broadcast %c2_i32_11 : i32 to vector<2x128xi32>
      %49 = arith.cmpi sle, %47, %48 : vector<2x128xi32>
      %50 = arith.andi %46, %49 : vector<2x128xi1>
      %51 = arith.extui %50 : vector<2x128xi1> to vector<2x128xi32>
      %52 = arith.sitofp %51 : vector<2x128xi32> to vector<2x128xf32>
      %53 = arith.sitofp %41 : vector<2x128xi32> to vector<2x128xf32>
      %54 = arith.sitofp %43 : vector<2x128xi32> to vector<2x128xf32>
      %55 = arith.mulf %53, %53 : vector<2x128xf32>
      %56 = arith.mulf %54, %54 : vector<2x128xf32>
      %57 = arith.addf %55, %56 : vector<2x128xf32>
      %cst_12 = arith.constant -0.0165289249 : f32
      %58 = vector.broadcast %cst_12 : f32 to vector<2x128xf32>
      %59 = arith.mulf %57, %58 : vector<2x128xf32>
      %60 = math.exp %59 : vector<2x128xf32>
      %cst_13 = arith.constant 0.0213507079 : f32
      %61 = vector.broadcast %cst_13 : f32 to vector<2x128xf32>
      %62 = arith.mulf %60, %61 : vector<2x128xf32>
      %cst_14 = arith.constant 0.17316018 : f32
      %63 = vector.broadcast %cst_14 : f32 to vector<2x128xf32>
      %64 = arith.subf %62, %63 : vector<2x128xf32>
      %65 = arith.mulf %52, %64 : vector<2x128xf32>
      %cst_15 = arith.constant 0.17316018 : f32
      %66 = vector.broadcast %cst_15 : f32 to vector<2x128xf32>
      %67 = arith.addf %65, %66 : vector<2x128xf32>
      %68 = arith.mulf %5, %52 : vector<2x128xf32>
      %69 = arith.subf %14, %68 : vector<2x128xf32>
      %70 = arith.mulf %67, %69 : vector<2x128xf32>
      %71 = vector.shape_cast %70 : vector<2x128xf32> to vector<1x2x128xf32>
      %cst_16 = arith.constant dense<0.000000e+00> : vector<1xf32>
      %72 = vector.multi_reduction <add>, %71, %cst_16 [1, 2] : vector<1x2x128xf32> to vector<1xf32>
      %73 = vector.shape_cast %72 : vector<1xf32> to vector<1x1x1xf32>
      %74 = vector.extract %73[0, 0, 0] : f32 from vector<1x1x1xf32>
      scf.yield %74 : f32
    } else {
      %30 = vector.shape_cast %14 : vector<2x128xf32> to vector<1x2x128xf32>
      %cst_10 = arith.constant dense<0.000000e+00> : vector<1xf32>
      %31 = vector.multi_reduction <add>, %30, %cst_10 [1, 2] : vector<1x2x128xf32> to vector<1xf32>
      %32 = vector.shape_cast %31 : vector<1xf32> to vector<1x1x1xf32>
      %33 = vector.extract %32[0, 0, 0] : f32 from vector<1x1x1xf32>
      %cst_11 = arith.constant 0.17316018 : f32
      %34 = arith.mulf %cst_11, %33 : f32
      scf.yield %34 : f32
    }
    %cst_5 = arith.constant 0.000000e+00 : f32
    %26 = vector.broadcast %cst_5 : f32 to vector<1x1x8x128xf32>
    %27 = vector.broadcast %25 : f32 to vector<1x1x8x128xf32>
    %28 = arith.addf %26, %27 : vector<1x1x8x128xf32>
    %c0_6 = arith.constant 0 : index
    %c0_7 = arith.constant 0 : index
    %c0_8 = arith.constant 0 : index
    %c0_9 = arith.constant 0 : index
    %29 = vector.load %arg5[%c0_6, %c0_7, %c0_8, %c0_9] : memref<1x1x8x128xf32, #tpu.memory_space<vmem>>, vector<1x1x8x128xf32>
    tpu.vector_store %arg5[%c0_6, %c0_7, %c0_8, %c0_9], %28 {strides = array<i32>} : memref<1x1x8x128xf32, #tpu.memory_space<vmem>>, vector<1x1x8x128xf32>,
    return
  }
  func.func @transform_0(%arg0: i32, %arg1: i32, %arg2: memref<2xi32, #tpu.memory_space<smem>>, %arg3: memref<2xi32, #tpu.memory_space<smem>>) -> (i32, i32, i32) {
    %c0_i32 = arith.constant 0 : i32
    %c0_i32_0 = arith.constant 0 : i32
    return %arg0, %arg1, %c0_i32 : i32, i32, i32
  }
  func.func @transform_1(%arg0: i32, %arg1: i32, %arg2: memref<2xi32, #tpu.memory_space<smem>>, %arg3: memref<2xi32, #tpu.memory_space<smem>>) -> (i32, i32, i32, i32) {
    %c0_i32 = arith.constant 0 : i32
    %c0_i32_0 = arith.constant 0 : i32
    %c0_i32_1 = arith.constant 0 : i32
    return %arg0, %arg1, %c0_i32, %c0_i32_0 : i32, i32, i32, i32
  }
}

</mosaic_0001>

<bundles_post_ra>
// kernel: gaussian_loss.1
= control target key start
LH: loop header
LB: loop body
LE: loop exit
PB: predicated region body
PF: predicated region fallthrough
CT: control target
= control target key end

     0   :  { %s462_s18 = smov [#allocation3]   ;;  %s463_s19 = smov [#allocation4]   ;;  %s562_s0 = inlined_call_operand.vmem [shape: s32[2], index: 0, kind: input, shape index: {}]   ;;  %s563_s2 = inlined_call_operand.vmem [shape: f32[2,2,128], index: 2, kind: input, shape index: {}]   ;;  %s564_s3 = inlined_call_operand.vmem [shape: f32[2,1,8,128], index: 3, kind: output, shape index: {}]   ;;  %s565_s1 = inlined_call_operand.vmem [shape: s32[2], index: 1, kind: input, shape index: {}]  }
   0x1   :  { %s9_s14 = sshll.u32 %s562_s0, 4  ;;  %s14_s17 = sshll.u32 %s565_s1, 4  ;;  %s10_s14 = int_to_ptr.vmem [resolvable:$true] %s9_s14  ;;  %s15_s17 = int_to_ptr.vmem [resolvable:$true] %s14_s17 }
   0x2   :  { %12 = dma.vmem_to_smem %s10_s14, 16, %s462_s18, [#allocation2] }
   0x3   :  { %17 = dma.vmem_to_smem %s15_s17, 16, %s463_s19, [#allocation2] }
   0x4   :  { %440 = dma.done.wait [#allocation2], 32 }
   0x5   :  { %441 = vsyncadd [#allocation2], 4294967264 }
   0x6   :  { %20 = sfence }
   0x7   :  { %s491_s20 = smov 0   ;;  %s493_s21 = smov 0  }
   0x8   :  { %s495_s22 = smov 0  }
   0x9 LB: > { %s38_s0 = sadd.s32 1, %s448_s21  ;;  %p335_p0 = scmp.ge.s32.totalorder %s452_s22, 1  ;;  %s452_s22 = sphi %s495_s22, %s26_s22   ;;  %s448_s21 = sphi %s493_s21, %s569_s21   ;;  %s444_s20 = sphi %s491_s20, %s568_s20  }
   0xa   : > { %p40_p1 = scmp.ge.s32.totalorder %s38_s0, 2  ;;  %p120_p2 = scmp.lt.s32.totalorder %s452_s22, 3 }
   0xc   : > { %s571_s0 = smov (%p40_p1, %s38_s0), 0  ;;  %p121_p3 = pnand %p335_p0, %p120_p2 }
   0xd   : > { %p144_p4 = scmp.lt.s32.totalorder (!%p121_p3), %s444_s20, 1  ;;  %s509_s1 = sld [smem:[#allocation3 + %s444_s20]] (!%p121_p3) }
   0xe   : > { %124 = sbr.rel (%p121_p3) target bundleno = 446 (0x1be), region = 24  ;;  %s511_s23 = sld [smem:[#allocation4 + %s444_s20]] (!%p121_p3) }
   0xf   : > { %s535_s9 = smov (!%p121_p3), 0  }
  0x13   : > { %v161_v0 = vlaneseq  ;;  %s573_s20 = smov (!%p144_p4, %s444_s20), 1  ;;  %s179_s5 = sadd.s32 2, %s509_s1 }
  0x14   : > { %s336_s24 = sshll.u32 %s573_s20, 1  ;;  %s337_s25 = sshll.u32 %s573_s20, 3 }
  0x15   : > { %v162_v1 = vshrl.u32 %v161_v0, 7  ;;  %s150_s28 = scalar_lea.vmem %s563_s2, %s336_s24  ;;  %s519_s4 = scalar_lea.vmem %s564_s3, %s337_s25 }
  0x16   : > { %v160_v2 = vld [vmem:[%s150_s28] sm:$0x3]  ;;  %s338_s6 = sadd.s32 4294967294, %s509_s1  ;;  %p523_p5 = scmp.ge.s32.totalorder %s179_s5, 0 }
  0x17   : > { %v164_v3 = vand.u32 2147483647, %v160_v2  ;;  %p527_p6 = scmp.le.s32.totalorder %s338_s6, 15  ;;  %v163_v13 = vmax.f32 %v160_v2, 0.0 }
  0x19   : > { %v165_v4 = vsub.f32 0.0, %v164_v3  ;;  %p184_p7 = pnand %p527_p6, %p523_p5 }
  0x1b   : > { %v166_v5 = vmul.f32 1.442695, %v165_v4 }
  0x1d   : > { %390 = vpow2.f32 %v166_v5 }
  0x23   : > { %v391_v6 = vpop.eup %390 }
  0x24   : > { %v168_v7 = vadd.f32 1.0, %v391_v6  ;;  %v171_v8 = vmul.f32 -0.5, %v391_v6  ;;  %v174_v10 = vand.u32 2147483647, %v391_v6 }
  0x26   : > { %392 = vlog2.f32 %v168_v7  ;;  %v172_v9 = vadd.f32 1.0, %v171_v8  ;;  %vm175_vm0 = vcmp.lt.f32.partialorder %v174_v10, 0.0004427343 }
  0x28   : > { %v173_v11 = vmul.f32 %v391_v6, %v172_v9 }
  0x2c   : > { %v393_v12 = vpop.eup %392  ;;  %187 = sbr.rel (%p184_p7) target bundleno = 263 (0x107), region = 28 }
  0x2d   : > { %v170_v14 = vmul.f32 0.6931472, %v393_v12 }
  0x2f   : > { %v176_v15 = vsel %vm175_vm0, %v173_v11, %v170_v14 }
  0x30   : > { %v177_v16 = vadd.f32 %v176_v15, %v163_v13 }
  0x31   : > { %v189_v17 = vand.u32 127, %v161_v0  ;;  %v190_v18 = vmul.u32 8, %v162_v1  ;;  %v198_v19 = vstv %s511_s23  ;;  %v196_v22 = vstv %s509_s1 }
  0x32   : > { %v464_v37 = vmov 0.0   ;;  %vm226_vm6 = vcmask 1041408  }
  0x33   : > { %v193_v20 = vshra.s32 %v189_v17, 4  ;;  %v195_v21 = vand.u32 15, %v189_v17 }
  0x35   : > { %v194_v23 = vadd.s32 %v193_v20, %v190_v18  ;;  %v199_v24 = vsub.s32 %v195_v21, %v198_v19 }
  0x37   : > { %v197_v25 = vsub.s32 %v194_v23, %v196_v22  ;;  %v212_v26 = vcvt.s32.f32 %v199_v24  ;;  %v205_v29 = vsub.s32 0, %v199_v24  ;;  %vm204_vm2 = vcmp.lt.s32.totalorder %v199_v24, 0 }
  0x39   : > { %v211_v27 = vcvt.s32.f32 %v197_v25  ;;  %v201_v28 = vsub.s32 0, %v197_v25  ;;  %v214_v30 = vmul.f32 %v212_v26, %v212_v26  ;;  %vm200_vm1 = vcmp.lt.s32.totalorder %v197_v25, 0 }
  0x3a   : > { %v206_v34 = vsel %vm204_vm2, %v205_v29, %v199_v24 }
  0x3b   : > { %v213_v31 = vmul.f32 %v211_v27, %v211_v27  ;;  %v202_v33 = vsel %vm200_vm1, %v201_v28, %v197_v25  ;;  %vm207_vm4 = vcmp.le.s32.totalorder %v206_v34, 2 }
  0x3c   : > { %vm203_vm3 = vcmp.le.s32.totalorder %v202_v33, 2 }
  0x3d   : > { %v215_v32 = vadd.f32 %v214_v30, %v213_v31  ;;  %vm208_vm5 = vmand %vm203_vm3, %vm207_vm4 }
  0x3e   : > { %v339_v38 = vsel %vm208_vm5, 1.0, %v464_v37 }
  0x3f   : > { %v216_v35 = vmul.f32 -0.016528925, %v215_v32  ;;  %v223_v41 = vmul.f32 %v339_v38, %v160_v2 }
  0x41   : > { %v217_v36 = vmul.f32 1.442695, %v216_v35  ;;  %v224_v44 = vsub.f32 %v177_v16, %v223_v41 }
  0x43   : > { %394 = vpow2.f32 %v217_v36 }
  0x49   : > { %v395_v39 = vpop.eup %394 }
  0x4a   : > { %v219_v40 = vmul.f32 0.021350708, %v395_v39 }
  0x4c   : > { %v340_v42 = vadd.f32 -0.17316018, %v219_v40 }
  0x4e   : > { %v221_v43 = vmul.f32 %v340_v42, %v339_v38 }
  0x50   : > { %v222_v45 = vadd.f32 0.17316018, %v221_v43 }
  0x52   : > { %v225_v46 = vmul.f32 %v224_v44, %v222_v45 }
  0x54   : > { %v227_v47 = vsel %vm226_vm6, %v225_v46, 0.0 }
  0x55   : > { %228 = vadd.xlane.f32.xlu0 %v227_v47 }
  0xc8   : > { %v229_v48 = vpop.xlane.xlu0 %228 }
  0xc9   : > { %v230_v49 = vrot.slane %v229_v48, 4 }
  0xcb   : > { %v231_v50 = vadd.f32 %v230_v49, %v229_v48 }
  0xcd   : > { %v232_v51 = vrot.slane %v231_v50, 2 }
  0xcf   : > { %v233_v52 = vadd.f32 %v232_v51, %v231_v50 }
  0xd1   : > { %v234_v53 = vrot.slane %v233_v52, 1 }
  0xd3   : > { %v235_v54 = vadd.f32 %v234_v53, %v233_v52 }
  0xd5   : > { %343 = vpush %v235_v54 }
 0x106   : > { %s344_s9 = spop %343  }
 0x107 PF: > { %s458_s10 = smov %s456_s9   ;;  %240 = sbr.rel (!%p184_p7) target bundleno = 444 (0x1bc), region = 32  ;;  %vm241_vm7 = vcmask (%p184_p7), 1041408   ;;  %s456_s9 = sphi %s535_s9, %s344_s9  }
 0x108   : > { %v242_v55 = vsel (%p184_p7), %vm241_vm7, %v177_v16, 0.0 }
 0x109   : > { %243 = vadd.xlane.f32.xlu0 (%p184_p7), %v242_v55 }
 0x17c   : > { %v244_v56 = vpop.xlane.xlu0 %243 }
 0x17d   : > { %v245_v57 = vrot.slane %v244_v56, 4 }
 0x17f   : > { %v246_v58 = vadd.f32 %v245_v57, %v244_v56 }
 0x181   : > { %v247_v59 = vrot.slane %v246_v58, 2 }
 0x183   : > { %v248_v60 = vadd.f32 %v247_v59, %v246_v58 }
 0x185   : > { %v249_v61 = vrot.slane %v248_v60, 1 }
 0x187   : > { %v250_v62 = vadd.f32 %v249_v61, %v248_v60 }
 0x189   : > { %345 = vpush %v250_v62 }
 0x1ba   : > { %s346_s11 = spop %345 }
 0x1bb   : > { %s252_s10 = smul.f32 0.17316018, %s346_s11  }
 0x1bc PF: > { %v254_v63 = vstv %s460_s10  ;;  %s460_s10 = sphi %s458_s10, %s252_s10  }
 0x1bd   : > { %256 = vst [vmem:[%s519_s4] sm:$0xff] %v254_v63 }
 0x1be PF: > { %s26_s22 = sadd.s32 1, %s452_s22   ;;  %s568_s20 = smov %s448_s21 }
 0x1bf   : > { %p23_p8 = scmp.ge.s32.totalorder %s26_s22, 4   ;;  %s569_s21 = smov %s571_s0 }
 0x1c1   :  { %25 = sbr.rel (!%p23_p8) target bundleno = 9 (0x9), region = 62 }

</bundles_post_ra>
